<compile_context>
chip_gen: v6e
topology: v6e:2x2x1
jax: 0.10.0
libtpu: 0.0.40
codegen_flags: <defaults>
</compile_context>

<pallas_src>
import functools

import jax
import jax.numpy as jnp
from jax import lax
from jax.experimental import pallas as pl
from jax.experimental.pallas import tpu as pltpu


def _focal_loss_kernel(x_ref, t_ref, a_ref, out_ref, *, gamma):
    x = x_ref[...]            # (tile_m, 128) f32
    t = t_ref[...]            # (tile_m, 128) f32
    a = a_ref[...]            # (tile_m, 1)   f32, broadcasts over lanes

    one_minus = 1.0 - x
    g = float(gamma)
    if g == int(g) and int(g) >= 0:
        pw = lax.integer_pow(one_minus, int(g))     # pure VPU
    else:
        pw = jnp.power(one_minus, g)                # float-exponent fallback

    term = a * pw * (t * jnp.log(x + 1e-7))         # (tile_m, 128)

    # Pure-VPU partial reduction: fold the (8,128) vreg groups together and
    # emit one dense (8, 128) partial-sum block per grid step.
    out_ref[...] = jnp.sum(term.reshape(-1, 8, 128), axis=0)


def _pick_tile_rows(m, target):
    """Largest multiple-of-8 divisor of m that is <= target (m % 8 == 0)."""
    t = min(target, m)
    t -= t % 8
    t = max(t, 8)
    while m % t:
        t -= 8
    return t


def focal_loss(inputs, targets, alpha, gamma, *, target_tile_rows=8192):
    """inputs/targets: (B, C, D1, D2, D3); alpha: (C,)."""
    B, C, D1, D2, D3 = inputs.shape
    S = D1 * D2 * D3
    n = S  # matches self.n computed from the actual spatial dims
    assert S % 128 == 0, "spatial volume must be a multiple of 128"
    rows_per_bc = S // 128
    M = B * C * rows_per_bc

    x = inputs.astype(jnp.float32).reshape(M, 128)
    t = targets.astype(jnp.float32).reshape(M, 128)
    a = jnp.broadcast_to(
        alpha.astype(jnp.float32).reshape(1, C, 1), (B, C, rows_per_bc)
    ).reshape(M, 1)

    # Pad rows to a multiple of 8 (zero targets / zero alpha => zero term).
    pad = (-M) % 8
    if pad:
        x = jnp.concatenate([x, jnp.ones((pad, 128), jnp.float32)], axis=0)
        t = jnp.concatenate([t, jnp.zeros((pad, 128), jnp.float32)], axis=0)
        a = jnp.concatenate([a, jnp.zeros((pad, 1), jnp.float32)], axis=0)
        M += pad

    tile_m = _pick_tile_rows(M, target_tile_rows)
    grid = (M // tile_m,)
    tile_bytes = tile_m * 128 * 4  # 4 MiB at the default 8192 rows

    partials = pl.pallas_call(
        functools.partial(_focal_loss_kernel, gamma=gamma),
        out_shape=jax.ShapeDtypeStruct((grid[0] * 8, 128), jnp.float32),
        grid_spec=pltpu.PrefetchScalarGridSpec(
            num_scalar_prefetch=0,
            grid=grid,
            in_specs=[
                pl.BlockSpec((tile_m, 128), lambda i: (i, 0)),
                pl.BlockSpec((tile_m, 128), lambda i: (i, 0)),
                pl.BlockSpec((tile_m, 1), lambda i: (i, 0)),
            ],
            out_specs=pl.BlockSpec((8, 128), lambda i: (i, 0)),
        ),
        compiler_params=pltpu.CompilerParams(
            dimension_semantics=("parallel",),
            # 2 big inputs x 2 pipeline buffers + tiny alpha/output buffers.
            vmem_limit_bytes=max(32 * 1024 * 1024, 5 * tile_bytes),
        ),
    )(x, t, a)

    # Final reduce / negate / scale on a tiny (grid*8, 128) array in plain JAX.
    return -jnp.sum(partials) / (n * B)


def focal_loss_ref(inputs, targets, alpha, gamma):
    B, C = inputs.shape[0], inputs.shape[1]
    n = inputs.shape[2] * inputs.shape[3] * inputs.shape[4]
    a = alpha.reshape(1, C, 1, 1, 1)
    fl = a * jnp.power(1.0 - inputs, gamma) * (targets * jnp.log(inputs + 1e-7))
    fl = fl.sum(axis=1).sum(axis=(1, 2, 3)) / n
    return -(fl.sum() / B)


if __name__ == "__main__":
    B, C, D1, D2, D3 = 2, 4, 16, 16, 8
    gamma = 2.0

    key = jax.random.PRNGKey(0)
    k1, k2 = jax.random.split(key)
    # inputs are probabilities in (0, 1); targets are soft labels in [0, 1].
    inputs = jax.nn.sigmoid(
        jax.random.normal(k1, (B, C, D1, D2, D3), dtype=jnp.float32)
    )
    targets = jax.random.uniform(k2, (B, C, D1, D2, D3), dtype=jnp.float32)
    # deterministic per-channel alpha (module's __init__ takes it as a tensor)
    alpha = jnp.linspace(0.25, 1.0, C, dtype=jnp.float32)

    out = focal_loss(inputs, targets, alpha, gamma)
    out = jax.block_until_ready(out)

    ref = focal_loss_ref(inputs, targets, alpha, gamma)
    assert jnp.allclose(out, ref, rtol=1e-5, atol=1e-5), (out, ref)

    print("KERNEL_OK")
</pallas_src>

<mosaic_0001>
module attributes {stable_mosaic.version = 11 : i64} {
  func.func @_focal_loss_kernel(%arg0: i32, %arg1: memref<128x128xf32, #tpu.memory_space<vmem>>, %arg2: memref<128x128xf32, #tpu.memory_space<vmem>>, %arg3: memref<128x1xf32, #tpu.memory_space<vmem>>, %arg4: memref<8x128xf32, #tpu.memory_space<vmem>>) attributes {dimension_semantics = [#tpu.dimension_semantics<parallel>], iteration_bounds = array<i64: 1>, scalar_prefetch = 0 : i64, scratch_operands = 0 : i64, tpu.core_type = #tpu.core_type<tc>, window_params = [{transform_indices = @transform_0, window_bounds = array<i64: 128, 128>}, {transform_indices = @transform_1, window_bounds = array<i64: 128, 128>}, {transform_indices = @transform_2, window_bounds = array<i64: 128, 1>}, {transform_indices = @transform_3, window_bounds = array<i64: 8, 128>}]} {
    %c0 = arith.constant 0 : index
    %c0_0 = arith.constant 0 : index
    %0 = vector.load %arg1[%c0, %c0_0] : memref<128x128xf32, #tpu.memory_space<vmem>>, vector<128x128xf32>
    %c0_1 = arith.constant 0 : index
    %c0_2 = arith.constant 0 : index
    %1 = vector.load %arg2[%c0_1, %c0_2] : memref<128x128xf32, #tpu.memory_space<vmem>>, vector<128x128xf32>
    %c0_3 = arith.constant 0 : index
    %c0_4 = arith.constant 0 : index
    %2 = vector.load %arg3[%c0_3, %c0_4] : memref<128x1xf32, #tpu.memory_space<vmem>>, vector<128x1xf32>
    %cst = arith.constant 1.000000e+00 : f32
    %3 = vector.broadcast %cst : f32 to vector<128x128xf32>
    %4 = arith.subf %3, %0 : vector<128x128xf32>
    %5 = arith.mulf %4, %4 : vector<128x128xf32>
    %6 = vector.broadcast %2 : vector<128x1xf32> to vector<128x128xf32>
    %7 = arith.mulf %6, %5 : vector<128x128xf32>
    %cst_5 = arith.constant 1.000000e-07 : f32
    %8 = vector.broadcast %cst_5 : f32 to vector<128x128xf32>
    %9 = arith.addf %0, %8 : vector<128x128xf32>
    %10 = math.log %9 : vector<128x128xf32>
    %11 = arith.mulf %1, %10 : vector<128x128xf32>
    %12 = arith.mulf %7, %11 : vector<128x128xf32>
    %13 = vector.shape_cast %12 : vector<128x128xf32> to vector<16x8x128xf32>
    %cst_6 = arith.constant dense<0.000000e+00> : vector<8x128xf32>
    %14 = vector.multi_reduction <add>, %13, %cst_6 [0] : vector<16x8x128xf32> to vector<8x128xf32>
    %c0_7 = arith.constant 0 : index
    %c0_8 = arith.constant 0 : index
    %15 = vector.load %arg4[%c0_7, %c0_8] : memref<8x128xf32, #tpu.memory_space<vmem>>, vector<8x128xf32>
    tpu.vector_store %arg4[%c0_7, %c0_8], %14 {strides = array<i32>} : memref<8x128xf32, #tpu.memory_space<vmem>>, vector<8x128xf32>,
    return
  }
  func.func @transform_0(%arg0: i32) -> (i32, i32) {
    %c0_i32 = arith.constant 0 : i32
    %c0_i32_0 = arith.constant 0 : i32
    return %arg0, %c0_i32 : i32, i32
  }
  func.func @transform_1(%arg0: i32) -> (i32, i32) {
    %c0_i32 = arith.constant 0 : i32
    %c0_i32_0 = arith.constant 0 : i32
    return %arg0, %c0_i32 : i32, i32
  }
  func.func @transform_2(%arg0: i32) -> (i32, i32) {
    %c0_i32 = arith.constant 0 : i32
    %c0_i32_0 = arith.constant 0 : i32
    return %arg0, %c0_i32 : i32, i32
  }
  func.func @transform_3(%arg0: i32) -> (i32, i32) {
    %c0_i32 = arith.constant 0 : i32
    %c0_i32_0 = arith.constant 0 : i32
    return %arg0, %c0_i32 : i32, i32
  }
}

</mosaic_0001>

<bundles_post_ra>
// kernel: tpu_custom_call.1
= control target key start
LH: loop header
LB: loop body
LE: loop exit
PB: predicated region body
PF: predicated region fallthrough
CT: control target
= control target key end

     0   :  { %8 = vsyncpa [#allocation3], 0  ;;  %s574_s0 = inlined_call_operand.vmem [shape: f32[128,128], index: 0, kind: input, shape index: {}]   ;;  %s575_s1 = inlined_call_operand.hbm [shape: f32[128,128], index: 1, kind: input, shape index: {}]   ;;  %s576_s2 = inlined_call_operand.vmem [shape: f32[128,1], index: 2, kind: input, shape index: {}]   ;;  %s577_s3 = inlined_call_operand.hbm [shape: f32[8,128], index: 3, kind: output, shape index: {}]  }
   0x1   :  { %9 = vsyncpa [#allocation4], 0  ;;  %s399_s12 = smov [#allocation2]  }
   0x2   :  { %s17_s13 = sshll.u32 %s399_s12, 4  ;;  %s18_s13 = int_to_ptr.vmem [resolvable:$true] %s17_s13 }
   0x3   :  { %s363_s14 = scalar_lea.vmem %s18_s13, 2048  ;;  %p368_p1 = scmp.lt.s32.totalorder %s18_s13, %s18_s13 }
   0x4   :  { %p364_p0 = scmp.ne.s32.totalorder %s18_s13, %s363_s14  ;;  %p369_p2 = scmp.lt.s32.totalorder %s363_s14, %s363_s14 }
   0x6   :  { %p370_p3 = por %p369_p2, %p368_p1 }
   0x8   :  { %p371_p4 = pnand %p370_p3, %p364_p0 }
   0xa   :  { %374 = shalt.err (!%p371_p4)
}
   0xb   :  { %s400_s15 = smov 128   ;;  %s401_s16 = smov 8  }
   0xc   :  { %23 = dma.hbm_to_vmem [thread:$0]  %s575_s1, 2048, %s18_s13, [#allocation3], %s400_s15, %s400_s15, %s401_s16  }
   0xd   :  { %395 = dma.done.wait [#allocation3], 2048  }
   0xe   :  { %396 = vsyncadd [#allocation3], 4294965248  ;;  %v402_v0 = vmov 0   ;;  %v63_v1 = vld [vmem:[%s576_s2 + $0x10] sm:$0xff]  ;;  %v61_v2 = vld [vmem:[%s576_s2] sm:$0xff] }
   0xf   :  { %322 = vset.pattern.permute.xlu1 %v402_v0  ;;  %321 = vset.pattern.permute.xlu0 %v402_v0  ;;  %v64_v3 = vld [vmem:[%s576_s2 + $0x18] sm:$0xff]  ;;  %v62_v4 = vld [vmem:[%s576_s2 + $0x8] sm:$0xff]  ;;  %v65_v6 = vld [vmem:[%s576_s2 + $0x20] sm:$0xff] }
  0x10   :  { %121 = vperm.xlu1 %322, %v63_v1   ;;  %111 = vperm.xlu0 %321, %v61_v2   ;;  %v66_v5 = vld [vmem:[%s576_s2 + $0x28] sm:$0xff]  ;;  %v68_v7 = vld [vmem:[%s576_s2 + $0x38] sm:$0xff]  ;;  %v67_v8 = vld [vmem:[%s576_s2 + $0x30] sm:$0xff] }
  0x11   :  { %v70_v9 = vld [vmem:[%s576_s2 + $0x48] sm:$0xff]  ;;  %v69_v10 = vld [vmem:[%s576_s2 + $0x40] sm:$0xff]  ;;  %v72_v11 = vld [vmem:[%s576_s2 + $0x58] sm:$0xff] }
  0x12   :  { %v71_v12 = vld [vmem:[%s576_s2 + $0x50] sm:$0xff]  ;;  %v74_v13 = vld [vmem:[%s576_s2 + $0x68] sm:$0xff]  ;;  %v73_v14 = vld [vmem:[%s576_s2 + $0x60] sm:$0xff] }
  0x13   :  { %v76_v15 = vld [vmem:[%s576_s2 + $0x78] sm:$0xff]  ;;  %v75_v16 = vld [vmem:[%s576_s2 + $0x70] sm:$0xff]  ;;  %v29_v17 = vld [vmem:[%s574_s0] sm:$0xff] }
  0x14   :  { %126 = vperm.xlu1 %322, %v64_v3   ;;  %116 = vperm.xlu0 %321, %v62_v4   ;;  %v30_v18 = vld [vmem:[%s574_s0 + $0x8] sm:$0xff]  ;;  %v31_v19 = vld [vmem:[%s574_s0 + $0x10] sm:$0xff]  ;;  %v205_v20 = vadd.f32 1e-07, %v29_v17  ;;  %v32_v22 = vld [vmem:[%s574_s0 + $0x18] sm:$0xff]  ;;  %v77_v39 = vsub.f32 1.0, %v29_v17 }
  0x15   :  { %v206_v21 = vadd.f32 1e-07, %v30_v18  ;;  %v207_v23 = vadd.f32 1e-07, %v31_v19  ;;  %v490_v24 = vld [vmem:[%s574_s0 + $0x20] sm:$0xff]  ;;  %v495_v26 = vld [vmem:[%s574_s0 + $0x28] sm:$0xff] }
  0x16   :  { %323 = vlog2.f32 %v205_v20  ;;  %v208_v25 = vadd.f32 1e-07, %v32_v22  ;;  %v209_v27 = vadd.f32 1e-07, %v490_v24  ;;  %v210_v28 = vadd.f32 1e-07, %v495_v26 }
  0x17   :  { %325 = vlog2.f32 %v206_v21  ;;  %v502_v29 = vld [vmem:[%s574_s0 + $0x30] sm:$0xff]  ;;  %v507_v30 = vld [vmem:[%s574_s0 + $0x38] sm:$0xff]  ;;  %v513_v32 = vld [vmem:[%s574_s0 + $0x40] sm:$0xff]  ;;  %v79_v42 = vsub.f32 1.0, %v31_v19  ;;  %v80_v43 = vsub.f32 1.0, %v32_v22  ;;  %v78_v44 = vsub.f32 1.0, %v30_v18 }
  0x18   :  { %136 = vperm.xlu1 %322, %v66_v5   ;;  %131 = vperm.xlu0 %321, %v65_v6   ;;  %327 = vlog2.f32 %v207_v23  ;;  %v211_v31 = vadd.f32 1e-07, %v502_v29  ;;  %v212_v33 = vadd.f32 1e-07, %v507_v30  ;;  %v519_v34 = vld [vmem:[%s574_s0 + $0x48] sm:$0xff]  ;;  %v526_v37 = vld [vmem:[%s574_s0 + $0x50] sm:$0xff]  ;;  %v93_v49 = vmul.f32 %v77_v39, %v77_v39 }
  0x19   :  { %329 = vlog2.f32 %v208_v25  ;;  %v213_v35 = vadd.f32 1e-07, %v513_v32  ;;  %v214_v36 = vadd.f32 1e-07, %v519_v34  ;;  %v531_v40 = vld [vmem:[%s574_s0 + $0x58] sm:$0xff]  ;;  %v537_v46 = vld [vmem:[%s574_s0 + $0x60] sm:$0xff]  ;;  %v95_v55 = vmul.f32 %v79_v42, %v79_v42 }
  0x1a   :  { %331 = vlog2.f32 %v209_v27  ;;  %v215_v45 = vadd.f32 1e-07, %v526_v37  ;;  %v216_v48 = vadd.f32 1e-07, %v531_v40  ;;  %v543_v52 = vld [vmem:[%s574_s0 + $0x68] sm:$0xff]  ;;  %v45_v57 = vld [vmem:[#allocation2] sm:$0xff]  ;;  %v96_v58 = vmul.f32 %v80_v43, %v80_v43 }
  0x1b   :  { %333 = vlog2.f32 %v210_v28  ;;  %v46_v59 = vld [vmem:[#allocation2 + $0x8] sm:$0xff]  ;;  %v217_v60 = vadd.f32 1e-07, %v537_v46  ;;  %v94_v63 = vmul.f32 %v78_v44, %v78_v44  ;;  %v81_v0 = vsub.f32 1.0, %v490_v24  ;;  %v550_v1 = vld [vmem:[%s574_s0 + $0x70] sm:$0xff]  ;;  %v49_v21 = vld [vmem:[#allocation2 + $0x20] sm:$0xff] }
  0x1c   :  { %146 = vperm.xlu1 %322, %v68_v7   ;;  %141 = vperm.xlu0 %321, %v67_v8   ;;  %335 = vlog2.f32 %v211_v31  ;;  %v47_v2 = vld [vmem:[#allocation2 + $0x10] sm:$0xff]  ;;  %v82_v3 = vsub.f32 1.0, %v495_v26  ;;  %v84_v4 = vsub.f32 1.0, %v507_v30  ;;  %v218_v5 = vadd.f32 1e-07, %v543_v52 }
  0x1d   :  { %337 = vlog2.f32 %v212_v33  ;;  %v219_v17 = vadd.f32 1e-07, %v550_v1  ;;  %v97_v22 = vmul.f32 %v81_v0, %v81_v0  ;;  %v50_v33 = vld [vmem:[#allocation2 + $0x28] sm:$0xff] }
  0x1e   :  { %339 = vlog2.f32 %v213_v35  ;;  %v98_v24 = vmul.f32 %v82_v3, %v82_v3 }
  0x1f   :  { %341 = vlog2.f32 %v214_v36 }
  0x20   :  { %156 = vperm.xlu1 %322, %v70_v9   ;;  %151 = vperm.xlu0 %321, %v69_v10   ;;  %343 = vlog2.f32 %v215_v45 }
  0x21   :  { %345 = vlog2.f32 %v216_v48 }
  0x22   :  { %347 = vlog2.f32 %v217_v60 }
  0x23   :  { %v324_v38 = vpop.eup %323  ;;  %349 = vlog2.f32 %v218_v5 }
  0x24   :  { %166 = vperm.xlu1 %322, %v72_v11   ;;  %161 = vperm.xlu0 %321, %v71_v12   ;;  %v326_v41 = vpop.eup %325  ;;  %v222_v50 = vmul.f32 0.6931472, %v324_v38  ;;  %v558_v11 = vld [vmem:[%s574_s0 + $0x78] sm:$0xff]  ;;  %351 = vlog2.f32 %v219_v17  ;;  %s403_s0 = smov [#allocation5]  }
  0x25   :  { %v328_v47 = vpop.eup %327  ;;  %v224_v51 = vmul.f32 0.6931472, %v326_v41  ;;  %v220_v26 = vadd.f32 1e-07, %v558_v11  ;;  %v85_v41 = vsub.f32 1.0, %v513_v32  ;;  %s307_s25 = sshll.u32 %s403_s0, 4  ;;  %s308_s25 = int_to_ptr.vmem [resolvable:$true] %s307_s25 }
  0x26   :  { %v330_v53 = vpop.eup %329  ;;  %v226_v62 = vmul.f32 0.6931472, %v328_v47  ;;  %v253_v8 = vmul.f32 %v222_v50, %v45_v57  ;;  %v51_v50 = vld [vmem:[#allocation2 + $0x30] sm:$0xff]  ;;  %s375_s26 = scalar_lea.vmem %s308_s25, 128  ;;  %p380_p6 = scmp.lt.s32.totalorder %s308_s25, %s308_s25 }
  0x27   :  { %v332_v61 = vpop.eup %331  ;;  %v228_v9 = vmul.f32 0.6931472, %v330_v53  ;;  %v254_v10 = vmul.f32 %v224_v51, %v46_v59  ;;  %v86_v51 = vsub.f32 1.0, %v519_v34  ;;  %353 = vlog2.f32 %v220_v26  ;;  %v52_v59 = vld [vmem:[#allocation2 + $0x38] sm:$0xff]  ;;  %p376_p5 = scmp.ne.s32.totalorder %s308_s25, %s375_s26  ;;  %p381_p7 = scmp.lt.s32.totalorder %s375_s26, %s375_s26 }
  0x28   :  { %176 = vperm.xlu1 %322, %v74_v13   ;;  %171 = vperm.xlu0 %321, %v73_v14   ;;  %v334_v6 = vpop.eup %333  ;;  %v48_v13 = vld [vmem:[#allocation2 + $0x18] sm:$0xff]  ;;  %v255_v19 = vmul.f32 %v226_v62, %v47_v2  ;;  %v101_v60 = vmul.f32 %v85_v41, %v85_v41  ;;  %v87_v62 = vsub.f32 1.0, %v526_v37  ;;  %v90_v26 = vsub.f32 1.0, %v543_v52 }
  0x29   :  { %v336_v23 = vpop.eup %335  ;;  %v232_v25 = vmul.f32 0.6931472, %v334_v6  ;;  %v256_v30 = vmul.f32 %v228_v9, %v48_v13  ;;  %v102_v34 = vmul.f32 %v86_v51, %v86_v51  ;;  %p382_p8 = por %p381_p7, %p380_p6 }
  0x2a   :  { %v234_v47 = vmul.f32 0.6931472, %v336_v23  ;;  %v103_v37 = vmul.f32 %v87_v62, %v87_v62 }
  0x2b   :  { %v258_v48 = vmul.f32 %v232_v25, %v50_v33  ;;  %p383_p9 = pnand %p382_p8, %p376_p5 }
  0x2c   :  { %186 = vperm.xlu1 %322, %v76_v15   ;;  %181 = vperm.xlu0 %321, %v75_v16   ;;  %v230_v15 = vmul.f32 0.6931472, %v332_v61  ;;  %v83_v16 = vsub.f32 1.0, %v502_v29  ;;  %v338_v29 = vpop.eup %337  ;;  %v259_v3 = vmul.f32 %v234_v47, %v51_v50  ;;  %v57_v47 = vld [vmem:[#allocation2 + $0x60] sm:$0xff] }
  0x2d   :  { %v340_v42 = vpop.eup %339  ;;  %v236_v57 = vmul.f32 0.6931472, %v338_v29 }
  0x2e   :  { %v257_v38 = vmul.f32 %v230_v15, %v49_v21  ;;  %v99_v39 = vmul.f32 %v83_v16, %v83_v16  ;;  %v342_v53 = vpop.eup %341  ;;  %v238_v61 = vmul.f32 0.6931472, %v340_v42 }
  0x2f   :  { %v344_v5 = vpop.eup %343  ;;  %v240_v6 = vmul.f32 0.6931472, %v342_v53  ;;  %v260_v13 = vmul.f32 %v236_v57, %v52_v59 }
  0x30   :  { %v242_v23 = vmul.f32 0.6931472, %v344_v5 }
  0x8b   :  { %v122_v54 = vpop.permute.xlu1 %121  ;;  %v112_v56 = vpop.permute.xlu0 %111 }
  0x8c   :  { %v189_v7 = vmul.f32 %v112_v56, %v93_v49  ;;  %v191_v18 = vmul.f32 %v122_v54, %v95_v55  ;;  %v100_v49 = vmul.f32 %v84_v4, %v84_v4  ;;  %v53_v4 = vld [vmem:[#allocation2 + $0x40] sm:$0xff] }
  0x8d   :  { %v261_v17 = vmul.f32 %v238_v61, %v53_v4 }
  0x8e   :  { %v269_v27 = vmul.f32 %v253_v8, %v189_v7  ;;  %v271_v43 = vmul.f32 %v255_v19, %v191_v18  ;;  %v88_v7 = vsub.f32 1.0, %v531_v40  ;;  %v346_v8 = vpop.eup %345  ;;  %v89_v18 = vsub.f32 1.0, %v537_v46  ;;  %v55_v40 = vld [vmem:[#allocation2 + $0x50] sm:$0xff] }
  0x8f   :  { %v127_v12 = vpop.permute.xlu1 %126  ;;  %v117_v14 = vpop.permute.xlu0 %116  ;;  %v244_v33 = vmul.f32 0.6931472, %v346_v8 }
  0x90   :  { %v190_v20 = vmul.f32 %v117_v14, %v94_v63  ;;  %v192_v28 = vmul.f32 %v127_v12, %v96_v58  ;;  %v54_v14 = vld [vmem:[#allocation2 + $0x48] sm:$0xff]  ;;  %v348_v19 = vpop.eup %347  ;;  %v104_v25 = vmul.f32 %v88_v7, %v88_v7 }
  0x91   :  { %v246_v46 = vmul.f32 0.6931472, %v348_v19 }
  0x92   :  { %v270_v31 = vmul.f32 %v254_v10, %v190_v20  ;;  %v272_v54 = vmul.f32 %v256_v30, %v192_v28 }
  0x93   :  { %v137_v35 = vpop.permute.xlu1 %136  ;;  %v132_v36 = vpop.permute.xlu0 %131  ;;  %v265_v59 = vmul.f32 %v246_v46, %v57_v47 }
  0x94   :  { %v285_v44 = vadd.f32 %v270_v31, %v269_v27  ;;  %v193_v45 = vmul.f32 %v132_v36, %v97_v22  ;;  %v194_v56 = vmul.f32 %v137_v35, %v98_v24  ;;  %v262_v24 = vmul.f32 %v240_v6, %v54_v14  ;;  %v350_v27 = vpop.eup %349  ;;  %v56_v35 = vld [vmem:[#allocation2 + $0x58] sm:$0xff] }
  0x95   :  { %v352_v41 = vpop.eup %351  ;;  %v248_v52 = vmul.f32 0.6931472, %v350_v27  ;;  %v60_v6 = vld [vmem:[#allocation2 + $0x78] sm:$0xff] }
  0x96   :  { %v286_v55 = vadd.f32 %v285_v44, %v271_v43  ;;  %v273_v63 = vmul.f32 %v257_v38, %v193_v45  ;;  %v274_v9 = vmul.f32 %v258_v48, %v194_v56  ;;  %v105_v38 = vmul.f32 %v89_v18, %v89_v18  ;;  %v354_v50 = vpop.eup %353  ;;  %v58_v56 = vld [vmem:[#allocation2 + $0x68] sm:$0xff] }
  0x97   :  { %v147_v58 = vpop.permute.xlu1 %146  ;;  %v142_v32 = vpop.permute.xlu0 %141  ;;  %v263_v45 = vmul.f32 %v242_v23, %v55_v40  ;;  %v106_v48 = vmul.f32 %v90_v26, %v90_v26  ;;  %v250_v62 = vmul.f32 0.6931472, %v352_v41  ;;  %v252_v5 = vmul.f32 0.6931472, %v354_v50 }
  0x98   :  { %v287_v0 = vadd.f32 %v286_v55, %v272_v54  ;;  %v195_v2 = vmul.f32 %v142_v32, %v99_v39  ;;  %v196_v12 = vmul.f32 %v147_v58, %v100_v49  ;;  %v91_v39 = vsub.f32 1.0, %v550_v1 }
  0x99   :  { %v92_v49 = vsub.f32 1.0, %v558_v11  ;;  %v264_v55 = vmul.f32 %v244_v33, %v56_v35 }
  0x9a   :  { %v288_v10 = vadd.f32 %v287_v0, %v273_v63  ;;  %v275_v20 = vmul.f32 %v259_v3, %v195_v2  ;;  %v276_v28 = vmul.f32 %v260_v13, %v196_v12  ;;  %v107_v1 = vmul.f32 %v91_v39, %v91_v39  ;;  %v59_v2 = vld [vmem:[#allocation2 + $0x70] sm:$0xff] }
  0x9b   :  { %v157_v15 = vpop.permute.xlu1 %156  ;;  %v152_v16 = vpop.permute.xlu0 %151  ;;  %v266_v63 = vmul.f32 %v248_v52, %v58_v56  ;;  %v108_v0 = vmul.f32 %v92_v49, %v92_v49  ;;  %v267_v12 = vmul.f32 %v250_v62, %v59_v2 }
  0x9c   :  { %v289_v21 = vadd.f32 %v288_v10, %v274_v9  ;;  %v197_v22 = vmul.f32 %v152_v16, %v101_v60  ;;  %v198_v31 = vmul.f32 %v157_v15, %v102_v34  ;;  %v268_v16 = vmul.f32 %v252_v5, %v60_v6 }
  0x9e   :  { %v290_v30 = vadd.f32 %v289_v21, %v275_v20  ;;  %v277_v42 = vmul.f32 %v261_v17, %v197_v22  ;;  %v278_v51 = vmul.f32 %v262_v24, %v198_v31 }
  0x9f   :  { %v167_v29 = vpop.permute.xlu1 %166  ;;  %v162_v36 = vpop.permute.xlu0 %161 }
  0xa0   :  { %v291_v43 = vadd.f32 %v290_v30, %v276_v28  ;;  %v199_v44 = vmul.f32 %v162_v36, %v103_v37  ;;  %v200_v54 = vmul.f32 %v167_v29, %v104_v25 }
  0xa2   :  { %v292_v53 = vadd.f32 %v291_v43, %v277_v42  ;;  %v279_v32 = vmul.f32 %v263_v45, %v199_v44  ;;  %v280_v3 = vmul.f32 %v264_v55, %v200_v54 }
  0xa3   :  { %v177_v57 = vpop.permute.xlu1 %176  ;;  %v172_v58 = vpop.permute.xlu0 %171 }
  0xa4   :  { %v293_v60 = vadd.f32 %v292_v53, %v278_v51  ;;  %v201_v61 = vmul.f32 %v172_v58, %v105_v38  ;;  %v202_v11 = vmul.f32 %v177_v57, %v106_v48 }
  0xa6   :  { %v294_v4 = vadd.f32 %v293_v60, %v279_v32  ;;  %v281_v8 = vmul.f32 %v265_v59, %v201_v61  ;;  %v282_v13 = vmul.f32 %v266_v63, %v202_v11 }
  0xa7   :  { %v187_v34 = vpop.permute.xlu1 %186  ;;  %v182_v7 = vpop.permute.xlu0 %181 }
  0xa8   :  { %v295_v9 = vadd.f32 %v294_v4, %v280_v3  ;;  %v203_v10 = vmul.f32 %v182_v7, %v107_v1  ;;  %v204_v15 = vmul.f32 %v187_v34, %v108_v0 }
  0xaa   :  { %v296_v14 = vadd.f32 %v295_v9, %v281_v8  ;;  %v283_v17 = vmul.f32 %v267_v12, %v203_v10  ;;  %v284_v18 = vmul.f32 %v268_v16, %v204_v15 }
  0xac   :  { %v297_v37 = vadd.f32 %v296_v14, %v282_v13 }
  0xae   :  { %v298_v19 = vadd.f32 %v297_v37, %v283_v17 }
  0xb0   :  { %v299_v20 = vadd.f32 %v298_v19, %v284_v18 }
  0xb2   :  { %300 = vst [vmem:[#allocation5] sm:$0xff] %v299_v20 }
  0xb3   :  { %386 = shalt.err (!%p383_p9)
}
  0xb4   :  { %310 = dma.vmem_to_hbm [thread:$0]  %s308_s25, 128, %s577_s3, [#allocation4]  }
  0xb5   :  { %397 = dma.done.wait [#allocation4], 128  }
  0xb6   :  { %398 = vsyncadd [#allocation4], 4294967168 }
  0xb7   :  { %314 = vsyncpa [#allocation3], 1 }
  0xb8   :  { %315 = vsyncpa [#allocation4], 1 }

</bundles_post_ra>
